<compile_context>
chip_gen: v6e
topology: v6e:2x2x1
jax: 0.10.0
libtpu: 0.0.40
codegen_flags: <defaults>
</compile_context>

<pallas_src>
import jax
import jax.numpy as jnp
from jax.experimental import pallas as pl
from jax.experimental.pallas import tpu as pltpu

LANE = 128
# VMEM bytes allowed for the double-buffered (input + output) blocks of one
# grid step.  16 MiB fits every generation with headroom (v5e scoped default
# 16 MiB, v6e/v7x 32 MiB; v7x physical VMEM is only 64 MiB).
VMEM_DB_BUDGET = 16 * 1024 * 1024
MAX_TM = 128 * 1024          # cap on lanes per grid step
MAX_BT = 8                   # cap on batch elements folded per step (unrolled)
MIN_GRID_STEPS = 4           # keep both v7x TensorCores busy


def _round_up(x, n):
    return ((x + n - 1) // n) * n


def _round_down_to(x, n):
    return max(n, (x // n) * n)


def _choose_tiles(b, m, c_in, c_out, itemsize):
    """Pick (tm, bt): lanes per grid step and batch elements folded per step."""
    bytes_per_lane = (c_in + c_out) * itemsize
    m_pad = _round_up(m, LANE)

    # Lane tile from the VMEM budget (factor 2 = double buffering of in+out).
    tm = VMEM_DB_BUDGET // (2 * bytes_per_lane)
    tm = min(_round_down_to(tm, LANE), MAX_TM, m_pad)

    # Small-M case: the whole spatial extent fits in one tile.  Fold several
    # batch elements into one grid step so each DMA stays large, but never so
    # many that fewer than MIN_GRID_STEPS steps remain.
    bt = 1
    if tm == m_pad and b > 1:
        step_bytes = m_pad * bytes_per_lane
        bt = min(MAX_BT, b, max(1, (VMEM_DB_BUDGET // 2) // max(step_bytes, 1)))
        bt = max(1, min(bt, b // MIN_GRID_STEPS)) if b >= MIN_GRID_STEPS else 1

    # If we still have almost no grid steps and tm can shrink, shrink it so
    # v7x's second TensorCore / the DMA pipeline has something to overlap.
    while (bt == 1 and tm > LANE
           and pl.cdiv(b, bt) * pl.cdiv(m, tm) < MIN_GRID_STEPS):
        tm = _round_down_to(tm // 2, LANE)

    return tm, bt


def _conv1x1_kernel(x_ref, w_ref, b_ref, o_ref):
    # x_ref: (bt, c_in, tm)   channels on sublanes, spatial on lanes
    # w_ref: (c_out, c_in)    weight (activation dtype)
    # b_ref: (c_out, 1)       bias kept in f32
    # o_ref: (bt, c_out, tm)
    w = w_ref[...]
    bias = b_ref[...]
    for i in range(x_ref.shape[0]):          # static unroll over folded batch
        acc = jnp.dot(w, x_ref[i], preferred_element_type=jnp.float32)
        o_ref[i] = (acc + bias).astype(o_ref.dtype)


def _pad_kernel(x_ref, o_ref):
    # x_ref: (bt, c_in, tm), o_ref: (bt, c_out, tm) with c_out > c_in.
    # NOTE: two sub-block stores (the second starts mid sublane-tile when c_in
    # is not a multiple of 8).  A single concatenated full-tile store would be
    # marginally cleaner, but sublane-unaligned in-register concat lowering is
    # less robust; on this bandwidth-bound path the difference is small.
    bt, c_in, tm = x_ref.shape
    c_out = o_ref.shape[1]
    o_ref[:, :c_in, :] = x_ref[...].astype(o_ref.dtype)
    o_ref[:, c_in:, :] = jnp.zeros((bt, c_out - c_in, tm), dtype=o_ref.dtype)


def align_forward(x, c_in, c_out, weight=None, bias=None):
    """Replicates Align.forward. x is NCHW: (B, c_in, T, V)."""
    assert x.shape[1] == c_in
    if c_in == c_out:
        return x

    b, _, t, v = x.shape
    m = t * v
    # Free reshape: NCHW is contiguous over the trailing (T, V) axes.
    x3 = x.reshape(b, c_in, m)
    itemsize = jnp.dtype(x.dtype).itemsize

    tm, bt = _choose_tiles(b, m, c_in, c_out, itemsize)
    grid = (pl.cdiv(b, bt), pl.cdiv(m, tm))

    block_bytes = bt * tm * (c_in + c_out) * itemsize
    vmem_limit = min(max(2 * block_bytes + (2 << 20), 8 << 20), 64 << 20)
    cparams = pltpu.CompilerParams(
        dimension_semantics=("parallel", "parallel"),
        vmem_limit_bytes=vmem_limit)

    in_spec = pl.BlockSpec((bt, c_in, tm), lambda bi, mi: (bi, 0, mi))
    out_spec = pl.BlockSpec((bt, c_out, tm), lambda bi, mi: (bi, 0, mi))

    if c_in > c_out:
        # 1x1 conv == per-pixel channel-mixing matmul: W @ x + bias.
        w = weight.reshape(c_out, c_in).astype(x.dtype)
        b2 = bias.reshape(c_out, 1).astype(jnp.float32)   # f32 bias add
        cost = pl.CostEstimate(
            flops=2 * b * m * c_in * c_out,
            transcendentals=0,
            bytes_accessed=(b * m * (c_in + c_out) + c_in * c_out) * itemsize
                           + c_out * 4)
        y3 = pl.pallas_call(
            _conv1x1_kernel,
            out_shape=jax.ShapeDtypeStruct((b, c_out, m), x.dtype),
            grid=grid,
            in_specs=[
                in_spec,
                pl.BlockSpec((c_out, c_in), lambda bi, mi: (0, 0)),
                pl.BlockSpec((c_out, 1), lambda bi, mi: (0, 0)),
            ],
            out_specs=out_spec,
            compiler_params=cparams,
            cost_estimate=cost,
        )(x3, w, b2)
    else:
        # c_in < c_out: zero-pad extra channels (matches torch.cat with zeros).
        cost = pl.CostEstimate(
            flops=0,
            transcendentals=0,
            bytes_accessed=b * m * (c_in + c_out) * itemsize)
        y3 = pl.pallas_call(
            _pad_kernel,
            out_shape=jax.ShapeDtypeStruct((b, c_out, m), x.dtype),
            grid=grid,
            in_specs=[in_spec],
            out_specs=out_spec,
            compiler_params=cparams,
            cost_estimate=cost,
        )(x3)

    return y3.reshape(b, c_out, t, v)


def _reference(x, c_in, c_out, weight=None, bias=None):
    """Pure-JAX reference replicating the PyTorch forward."""
    if c_in > c_out:
        w = weight.reshape(c_out, c_in).astype(jnp.float32)
        y = jnp.einsum("bctv,oc->botv", x.astype(jnp.float32), w,
                       precision=jax.lax.Precision.HIGHEST)
        y = y + bias.reshape(1, c_out, 1, 1).astype(jnp.float32)
        return y.astype(x.dtype)
    elif c_in < c_out:
        b, _, t, v = x.shape
        z = jnp.zeros((b, c_out - c_in, t, v), dtype=x.dtype)
        return jnp.concatenate([x, z], axis=1)
    return x


if __name__ == "__main__":
    key = jax.random.PRNGKey(0)

    def check_conv(B, c_in, c_out, T, V, key):
        k0, k1, k2, key = jax.random.split(key, 4)
        x = jax.random.normal(k0, (B, c_in, T, V), dtype=jnp.float32)
        weight = jax.random.normal(k1, (c_out, c_in, 1, 1), dtype=jnp.float32) * 0.1
        bias = jax.random.normal(k2, (c_out,), dtype=jnp.float32) * 0.1
        out = jax.block_until_ready(align_forward(x, c_in, c_out, weight, bias))
        ref = _reference(x, c_in, c_out, weight, bias)
        assert out.shape == (B, c_out, T, V)
        assert jnp.allclose(out, ref, atol=1e-5, rtol=1e-5), \
            float(jnp.max(jnp.abs(out - ref)))
        return key

    # ---- c_in > c_out -> 1x1 conv path ----
    key = check_conv(2, 8, 4, 8, 16, key)    # M = 128
    key = check_conv(2, 8, 4, 6, 20, key)    # M = 120 (not a multiple of 128)
    key = check_conv(8, 8, 4, 8, 16, key)    # exercises batch folding (bt > 1)

    # ---- c_in < c_out -> zero-pad path ----
    c_in, c_out = 4, 8
    k3, key = jax.random.split(key)
    x2 = jax.random.normal(k3, (2, c_in, 8, 16), dtype=jnp.float32)
    out_pad = jax.block_until_ready(align_forward(x2, c_in, c_out))
    ref_pad = _reference(x2, c_in, c_out)
    assert out_pad.shape == (2, c_out, 8, 16)
    assert jnp.array_equal(out_pad, ref_pad)

    # ---- c_in == c_out -> identity ----
    out_id = jax.block_until_ready(align_forward(x2, c_in, c_in))
    assert jnp.array_equal(out_id, x2)

    print("KERNEL_OK")
</pallas_src>

<mosaic_0001>
module attributes {stable_mosaic.version = 11 : i64} {
  func.func @_conv1x1_kernel(%arg0: i32, %arg1: i32, %arg2: memref<1x8x128xf32, #tpu.memory_space<vmem>>, %arg3: memref<4x8xf32, #tpu.memory_space<vmem>>, %arg4: memref<4x1xf32, #tpu.memory_space<vmem>>, %arg5: memref<1x4x128xf32, #tpu.memory_space<vmem>>) attributes {dimension_semantics = [#tpu.dimension_semantics<parallel>, #tpu.dimension_semantics<parallel>], iteration_bounds = array<i64: 2, 1>, scalar_prefetch = 0 : i64, scratch_operands = 0 : i64, tpu.core_type = #tpu.core_type<tc>, window_params = [{transform_indices = @transform_0, window_bounds = array<i64: 1, 8, 128>}, {pipeline_mode = #tpu.pipeline_mode<synchronous>, transform_indices = @transform_1, window_bounds = array<i64: 4, 8>}, {pipeline_mode = #tpu.pipeline_mode<synchronous>, transform_indices = @transform_2, window_bounds = array<i64: 4, 1>}, {transform_indices = @transform_3, window_bounds = array<i64: 1, 4, 128>}]} {
    %c0 = arith.constant 0 : index
    %c0_0 = arith.constant 0 : index
    %0 = vector.load %arg3[%c0, %c0_0] : memref<4x8xf32, #tpu.memory_space<vmem>>, vector<4x8xf32>
    %c0_1 = arith.constant 0 : index
    %c0_2 = arith.constant 0 : index
    %1 = vector.load %arg4[%c0_1, %c0_2] : memref<4x1xf32, #tpu.memory_space<vmem>>, vector<4x1xf32>
    %c0_3 = arith.constant 0 : index
    %c0_4 = arith.constant 0 : index
    %c0_5 = arith.constant 0 : index
    %2 = vector.load %arg2[%c0_3, %c0_4, %c0_5] : memref<1x8x128xf32, #tpu.memory_space<vmem>>, vector<1x8x128xf32>
    %3 = vector.shape_cast %2 : vector<1x8x128xf32> to vector<8x128xf32>
    %cst = arith.constant dense<0.000000e+00> : vector<4x128xf32>
    %4 = tpu.matmul %0, %3, %cst {dimension_numbers = #tpu.dot_dimension_numbers<[1], [0], [0], [1], [0, 0, 1, 1], [], []>} : vector<4x8xf32>, vector<8x128xf32>, vector<4x128xf32> -> vector<4x128xf32>
    %5 = vector.broadcast %1 : vector<4x1xf32> to vector<4x128xf32>
    %6 = arith.addf %4, %5 : vector<4x128xf32>
    %c0_6 = arith.constant 0 : index
    %c0_7 = arith.constant 0 : index
    %c0_8 = arith.constant 0 : index
    %7 = vector.load %arg5[%c0_6, %c0_7, %c0_8] : memref<1x4x128xf32, #tpu.memory_space<vmem>>, vector<1x4x128xf32>
    %8 = vector.shape_cast %7 : vector<1x4x128xf32> to vector<4x128xf32>
    %9 = vector.shape_cast %6 : vector<4x128xf32> to vector<1x4x128xf32>
    tpu.vector_store %arg5[%c0_6, %c0_7, %c0_8], %9 {strides = array<i32>} : memref<1x4x128xf32, #tpu.memory_space<vmem>>, vector<1x4x128xf32>,
    return
  }
  func.func @transform_0(%arg0: i32, %arg1: i32) -> (i32, i32, i32) {
    %c0_i32 = arith.constant 0 : i32
    %c0_i32_0 = arith.constant 0 : i32
    return %arg0, %c0_i32, %arg1 : i32, i32, i32
  }
  func.func @transform_1(%arg0: i32, %arg1: i32) -> (i32, i32) {
    %c0_i32 = arith.constant 0 : i32
    %c0_i32_0 = arith.constant 0 : i32
    %c0_i32_1 = arith.constant 0 : i32
    return %c0_i32, %c0_i32_0 : i32, i32
  }
  func.func @transform_2(%arg0: i32, %arg1: i32) -> (i32, i32) {
    %c0_i32 = arith.constant 0 : i32
    %c0_i32_0 = arith.constant 0 : i32
    %c0_i32_1 = arith.constant 0 : i32
    return %c0_i32, %c0_i32_0 : i32, i32
  }
  func.func @transform_3(%arg0: i32, %arg1: i32) -> (i32, i32, i32) {
    %c0_i32 = arith.constant 0 : i32
    %c0_i32_0 = arith.constant 0 : i32
    return %arg0, %c0_i32, %arg1 : i32, i32, i32
  }
}

</mosaic_0001>

<bundles_post_ra>
// kernel: tpu_custom_call.1
= control target key start
LH: loop header
LB: loop body
LE: loop exit
PB: predicated region body
PF: predicated region fallthrough
CT: control target
= control target key end

     0   :  { %8 = vsyncpa [#allocation3], 0  ;;  %s750_s0 = inlined_call_operand.hbm [shape: f32[2,8,128], index: 0, kind: input, shape index: {}]   ;;  %s751_s1 = inlined_call_operand.vmem [shape: f32[4,8], index: 1, kind: input, shape index: {}]   ;;  %s752_s2 = inlined_call_operand.vmem [shape: f32[4,1], index: 2, kind: input, shape index: {}]   ;;  %s753_s3 = inlined_call_operand.hbm [shape: f32[2,4,128], index: 3, kind: output, shape index: {}]  }
   0x1   :  { %10 = vsyncpa [#allocation3 + $0x1], 0 }
   0x2   :  { %11 = vsyncpa [#allocation4], 0 }
   0x3   :  { %13 = vsyncpa [#allocation4 + $0x1], 0  ;;  %s603_s12 = smov 0   ;;  %s605_s13 = smov 0  }
   0x4   :  { %s607_s14 = smov 0   ;;  %s609_s15 = smov 0  }
   0x5   :  { %s611_s16 = smov 0   ;;  %s613_s17 = smov 0  }
   0x6 LB: > { %s381_s18 = sadd.s32 4294967295, %s576_s17   ;;  %s382_s19 = sadd.s32 4294967294, %s576_s17   ;;  %s576_s17 = sphi %s613_s17, %s19_s17   ;;  %s572_s16 = sphi %s611_s16, %s765_s16   ;;  %s568_s15 = sphi %s609_s15, %s764_s15   ;;  %s564_s14 = sphi %s607_s14, %s763_s14   ;;  %s560_s13 = sphi %s605_s13, %s762_s13   ;;  %s556_s12 = sphi %s603_s12, %s761_s12  }
   0x7   : > { %s31_s20 = sadd.s32 1, %s572_s16  ;;  %s40_s21 = sadd.s32 1, %s564_s14 }
   0x8   : > { %p33_p0 = scmp.ge.s32.totalorder %s31_s20, 2  ;;  %p47_p1 = scmp.ne.s32.totalorder %s564_s14, %s560_s13 }
   0x9   : > { %p48_p2 = scmp.eq.s32.totalorder %s576_s17, 0  ;;  %p53_p3 = scmp.ne.s32.totalorder %s560_s13, %s556_s12 }
   0xa   : > { %s767_s20 = smov (%p33_p0, %s31_s20), 0  ;;  %p54_p5 = scmp.eq.s32.totalorder %s381_s18, 0 }
   0xb   : > { %p644_p4 = por %p48_p2, %p47_p1  ;;  %s35_s23 = ssub.s32 %s572_s16, %s767_s20 }
   0xc   : > { %p121_p6 = scmp.eq.s32.totalorder %s381_s18, 1  ;;  %p38_p7 = scmp.eq.s32.totalorder %s35_s23, 0 }
   0xd   : > { %p650_p8 = por %p54_p5, %p53_p3  ;;  %p127_p10 = scmp.eq.s32.totalorder %s382_s19, 1 }
   0xe   : > { %p654_p9 = por %p121_p6, %p47_p1  ;;  %p414_p13 = scmp.lt.s32.totalorder %s576_s17, 2 }
   0xf   : > { %s659_s26 = scalar_select %p38_p7, %s564_s14, %s40_s21  }
  0x10   : > { %p661_p11 = por %p127_p10, %p53_p3  ;;  %s153_s28 = sand.u32 1, %s564_s14  }
  0x11   : > { %s385_s29 = sshll.u32 %s153_s28, 3  ;;  %s386_s30 = sshll.u32 %s572_s16, 7 }
  0x12   : > { %s757_s27 = scalar_select %p661_p11, 1, 0 }
  0x13   : > { %s163_s6 = scalar_lea.hbm %s750_s0, %s386_s30  ;;  %s157_s7 = scalar_lea.vmem [#allocation2], %s385_s29 }
  0x14   : > { %s165_s8 = sshll.u32 %s157_s7, 4  ;;  %p674_p0 = pnand %p414_p13, %p644_p4  ;;  %s166_s8 = int_to_ptr.vmem [resolvable:$true] %s165_s8 }
  0x15   : > { %p387_p1 = scmp.ge.s32.totalorder %s576_s17, 1  ;;  %p170_p2 = scmp.lt.s32.totalorder %s576_s17, 3 }
  0x16   : > { %s154_s10 = scalar_lea.sflag [#allocation3], %s153_s28  ;;  %p470_p3 = pneg %p674_p0 }
  0x17   : > { %s481_s11 = scalar_lea.vmem %s166_s8, 128  ;;  %s578_s18 = smov [#allocation2]  }
  0x18   : > { %p482_p5 = scmp.ne.s32.totalorder %s166_s8, %s481_s11  ;;  %s486_s19 = sshll.u32 %s578_s18, 4  ;;  %s487_s19 = int_to_ptr.vmem [resolvable:$false] %s486_s19 }
  0x19   : > { %s488_s21 = scalar_lea.vmem %s487_s19, 256  ;;  %p489_p10 = scmp.lt.s32.totalorder %s166_s8, %s487_s19 }
  0x1a   : > { %p484_p6 = pnand %p482_p5, %p470_p3  ;;  %p490_p12 = scmp.lt.s32.totalorder %s488_s21, %s481_s11 }
  0x1c   : > { %p485_p7 = pneg %p484_p6  ;;  %p491_p4 = por %p490_p12, %p489_p10 }
  0x1e   : > { %p492_p13 = pnand %p491_p4, %p485_p7 }
  0x20   : > { %495 = shalt.err (!%p492_p13)
}
  0x21   : > { %409 = dma.hbm_to_vmem [thread:$0]  (!%p674_p0), %s163_s6, 128, %s166_s8, %s154_s10  }
  0x22   : > { %p171_p11 = pnand %p387_p1, %p170_p2 }
  0x23   : > { %s689_s22 = sand.u32 (!%p171_p11), 1, %s560_s13  }
  0x24   : > { %174 = sbr.rel (%p171_p11) target bundleno = 253 (0xfd), region = 32  ;;  %s388_s23 = sshll.u32 (!%p171_p11), %s689_s22, 3 }
  0x25   : > { %s177_s28 = scalar_lea.sflag (!%p171_p11), [#allocation3], %s689_s22  ;;  %s180_s29 = scalar_lea.vmem (!%p171_p11), [#allocation2], %s388_s23 }
  0x29   : > { %547 = dma.done.wait (%p650_p8), %s177_s28, 128  }
  0x2a   : > { %549 = vsyncadd (%p650_p8), %s177_s28, 4294967168  ;;  %v579_v0 = vmov 0.0   ;;  %vm580_vm0 = vmmov 0   ;;  %v581_v1 = vmov 0   ;;  %vm211_vm1 = vcmask 64512   ;;  %v205_v2 = vld [vmem:[%s180_s29] sm:$0xff] }
  0x2b   : > { %397 = vmatprep.subr.mxu0 %v579_v0  ;;  %399 = vmatprep.mubr.msk.f32.mxu0 %vm580_vm0, %v579_v0  ;;  %v203_v3 = vld [vmem:[%s751_s1] sm:$0xf]  ;;  %s389_s24 = sshll.u32 %s689_s22, 2  ;;  %s392_s7 = sshll.u32 %s568_s15, 6 }
  0x2c   : > { %467 = vset.pattern.permute.xlu0 %v581_v1  ;;  %v204_v4 = vld [vmem:[%s752_s2] sm:$0xf]  ;;  %398 = vmatpush3.msra.mxu0 %v205_v2  ;;  %s202_s8 = scalar_lea.vmem [#allocation5], %s389_s24  ;;  %s708_s18 = scalar_lea.hbm %s753_s3, %s392_s7 }
  0x2d   : > { %208 = vperm.xlu0 %467, %v204_v4   ;;  %400 = vmatmul.mubr.msk.f32.vlgmr.msra.gmra.mxu0 %vm211_vm1, %v203_v3  ;;  %s301_s9 = sshll.u32 %s202_s8, 4  ;;  %s287_s19 = scalar_lea.sflag [#allocation4], %s689_s22  ;;  %s302_s9 = int_to_ptr.vmem [resolvable:$true] %s301_s9 }
  0x2e   : > { %s496_s21 = scalar_lea.vmem %s302_s9, 64  ;;  %s582_s23 = smov [#allocation5]  }
  0x2f   : > { %p497_p8 = scmp.ne.s32.totalorder %s302_s9, %s496_s21  ;;  %s500_s15 = sshll.u32 %s582_s23, 4  ;;  %s501_s15 = int_to_ptr.vmem [resolvable:$false] %s500_s15 }
  0x30   : > { %s502_s28 = scalar_lea.vmem %s501_s15, 128  ;;  %p503_p0 = scmp.lt.s32.totalorder %s302_s9, %s501_s15 }
  0x31   : > { %p498_p11 = pnand %p497_p8, %p654_p9  ;;  %p504_p1 = scmp.lt.s32.totalorder %s502_s28, %s496_s21 }
  0x33   : > { %p499_p12 = pneg %p498_p11  ;;  %p505_p2 = por %p504_p1, %p503_p0 }
  0x35   : > { %p506_p3 = pnand %p505_p2, %p499_p12 }
  0xa8   : > { %v209_v5 = vpop.permute.xlu0 %208 }
  0xed   : > { %v281_v6 = vpop.f32.mrf.mxu0 }
  0xee   : > { %v282_v7 = vadd.f32 %v281_v6, %v209_v5 }
  0xef   : > { %v401_v8 = vpop.f32.mrf.mxu0 }
  0xf0   : > { %285 = vst [vmem:[%s202_s8] sm:$0xf] %v282_v7 }
  0xf1   : > { %509 = shalt.err (!%p506_p3)
}
  0xf2   : > { %s510_s29 = scalar_lea.hbm %s708_s18, 64  ;;  %s514_s4 = scalar_lea.hbm %s753_s3, 128 }
  0xf3   : > { %p511_p5 = scmp.ne.s32.totalorder %s708_s18, %s510_s29  ;;  %p515_p10 = scmp.lt.s32.totalorder %s708_s18, %s753_s3 }
  0xf4   : > { %p516_p4 = scmp.lt.s32.totalorder %s514_s4, %s510_s29 }
  0xf5   : > { %p512_p6 = pnand %p511_p5, %p654_p9 }
  0xf6   : > { %p517_p13 = por %p516_p4, %p515_p10 }
  0xf7   : > { %p513_p7 = pneg %p512_p6 }
  0xf9   : > { %p518_p8 = pnand %p517_p13, %p513_p7 }
  0xfb   : > { %521 = shalt.err (!%p518_p8)
}
  0xfc   : > { %404 = dma.vmem_to_hbm [thread:$0]  (%p654_p9), %s302_s9, 64, %s708_s18, %s287_s19  }
  0xfd PF: > { %s313_s24 = sand.u32 1, %s556_s12   ;;  %p759_p11 = scmp.ne.s32.totalorder %s757_s27, 0 }
  0xfe   : > { %p760_p12 = scmp.ge.s32.totalorder %s576_s17, 2  ;;  %s314_s7 = scalar_lea.sflag [#allocation4], %s313_s24 }
 0x100   : > { %p411_p0 = pnand %p760_p12, %p759_p11 }
 0x102   : > { %p412_p1 = pneg %p411_p0 }
 0x104   : > { %551 = dma.done.wait (%p412_p1), %s314_s7, 64  }
 0x105   : > { %553 = vsyncadd (%p412_p1), %s314_s7, 4294967232  ;;  %s19_s17 = sadd.s32 1, %s576_s17   ;;  %s761_s12 = smov %s560_s13 }
 0x106   : > { %p16_p2 = scmp.ge.s32.totalorder %s19_s17, 4   ;;  %s762_s13 = smov %s564_s14 }
 0x107   : > { %s763_s14 = smov %s659_s26  ;;  %s764_s15 = smov %s572_s16 }
 0x108   : > { %s765_s16 = smov %s767_s20  ;;  %18 = sbr.rel (!%p16_p2) target bundleno = 6 (0x6), region = 77 }
 0x10d   :  { %319 = vsyncpa [#allocation3], 1 }
 0x10e   :  { %321 = vsyncpa [#allocation3 + $0x1], 1 }
 0x10f   :  { %322 = vsyncpa [#allocation4], 1 }
 0x110   :  { %324 = vsyncpa [#allocation4 + $0x1], 1 }

</bundles_post_ra>
